<compile_context>
chip_gen: v7x
topology: tpu7x:2x2x1
jax: 0.10.0
libtpu: 0.0.40
codegen_flags: <defaults>
</compile_context>

<pallas_src>
import jax
import jax.numpy as jnp
from jax.experimental import pallas as pl
from jax.experimental.pallas import tpu as pltpu

_NUM_CORES = 2     # leading "parallel" grid axis (uses both v7x TensorCores)
_SUBLANES = 8
_LANES = 128


def _round_up(x, m):
    return ((x + m - 1) // m) * m


def _make_kernel(quantiles, inv_n, c_valid, tile_c, tiles_per_core, need_mask):
    qs = tuple(float(q) for q in quantiles)
    inv_n = float(inv_n)

    def pinball(preds_ref, target_ref):
        # (8, TILE_C) f32 sum over quantiles of the pinball loss, combined in
        # registers so the accumulator is touched only once per step.
        t = target_ref[...].astype(jnp.float32)
        contrib = None
        for qi, q in enumerate(qs):
            e = t - preds_ref[qi].astype(jnp.float32)
            term = jnp.maximum((q - 1.0) * e, q * e)
            contrib = term if contrib is None else contrib + term
        return contrib

    def kernel(preds_ref, target_ref, out_ref, acc_ref):
        j = pl.program_id(1)

        @pl.when(j == 0)
        def _init():
            acc_ref[...] = jnp.zeros_like(acc_ref)

        if not need_mask:
            # C divides evenly into tiles and tiles split evenly across cores:
            # hot path has zero masking work.
            acc_ref[...] += pinball(preds_ref, target_ref)
        else:
            # Logical (unclamped) tile index. The input index_maps clamp it so
            # DMAs stay in bounds; columns beyond the valid extent are masked.
            blk = pl.program_id(0) * tiles_per_core + j
            is_full = (blk + 1) * tile_c <= c_valid

            @pl.when(is_full)
            def _full():
                acc_ref[...] += pinball(preds_ref, target_ref)

            @pl.when(jnp.logical_not(is_full))
            def _ragged():
                col = (jax.lax.broadcasted_iota(jnp.int32, (_SUBLANES, tile_c), 1)
                       + blk * tile_c)
                acc_ref[...] += jnp.where(col < c_valid,
                                          pinball(preds_ref, target_ref),
                                          jnp.float32(0.0))

        @pl.when(j == tiles_per_core - 1)
        def _fin():
            total = jnp.sum(acc_ref[...]) * jnp.float32(inv_n)
            # Lane-aligned (1, 8, 128) output block: the per-core partial sits
            # at [0, 0, 0], the rest is zero, so jnp.sum outside combines cores.
            sub = jax.lax.broadcasted_iota(jnp.int32, (1, _SUBLANES, _LANES), 1)
            lane = jax.lax.broadcasted_iota(jnp.int32, (1, _SUBLANES, _LANES), 2)
            out_ref[...] = jnp.where((sub == 0) & (lane == 0),
                                     total, jnp.float32(0.0))

    return kernel


def quantile_loss(preds, target, quantiles, *, vmem_budget_mb=24, max_tile_c=None):
    """preds: (N, Q), target: (N,), quantiles: length-Q list -> scalar f32 loss."""
    N, Q = preds.shape
    assert target.shape == (N,)
    assert N > 0 and Q > 0
    qs = tuple(float(q) for q in quantiles)

    # --- dense (Q, 8, C) / (8, C) layout -------------------------------------
    # Zero pad N up to a multiple of 8*128 so C is lane-aligned and >= 1 tile.
    # Zero-padded rows contribute exactly 0 pinball loss; the mean divides by
    # the true N.  Under jit this pad fuses with the relayout copy below.
    n_pad = _round_up(N, _SUBLANES * _LANES)
    if n_pad != N:
        preds = jnp.pad(preds, ((0, n_pad - N), (0, 0)))
        target = jnp.pad(target, ((0, n_pad - N),))
    C = n_pad // _SUBLANES
    preds_r = jnp.transpose(preds).reshape(Q, _SUBLANES, C)
    target_r = jnp.reshape(target, (_SUBLANES, C))

    # --- tile sizing from an explicit VMEM budget (safe on v5e/v6e/v7x) ------
    p_item = jnp.dtype(preds.dtype).itemsize
    t_item = jnp.dtype(target.dtype).itemsize
    # Per TILE_C column: double-buffered preds + target input blocks + f32 acc.
    bytes_per_col = 2 * _SUBLANES * (Q * p_item + t_item) + _SUBLANES * 4
    budget = int(vmem_budget_mb) * 1024 * 1024
    tile_c = (budget // bytes_per_col) // _LANES * _LANES
    if max_tile_c is not None:
        tile_c = min(tile_c, (int(max_tile_c) // _LANES) * _LANES)
    tile_c = max(_LANES, min(tile_c, C))

    num_tiles = (C + tile_c - 1) // tile_c
    tiles_per_core = (num_tiles + _NUM_CORES - 1) // _NUM_CORES
    need_mask = (C % tile_c != 0) or (num_tiles % _NUM_CORES != 0)
    last_blk = num_tiles - 1

    def preds_map(core, j):
        return (0, 0, jnp.minimum(core * tiles_per_core + j, last_blk))

    def target_map(core, j):
        return (0, jnp.minimum(core * tiles_per_core + j, last_blk))

    kernel = _make_kernel(qs, 1.0 / float(N), C, tile_c, tiles_per_core, need_mask)

    vmem_limit = int(bytes_per_col * tile_c + 8 * 1024 * 1024)

    partials = pl.pallas_call(
        kernel,
        out_shape=jax.ShapeDtypeStruct((_NUM_CORES, _SUBLANES, _LANES), jnp.float32),
        grid_spec=pltpu.PrefetchScalarGridSpec(
            num_scalar_prefetch=0,
            grid=(_NUM_CORES, tiles_per_core),
            in_specs=[
                pl.BlockSpec((Q, _SUBLANES, tile_c), preds_map),
                pl.BlockSpec((_SUBLANES, tile_c), target_map),
            ],
            out_specs=pl.BlockSpec((1, _SUBLANES, _LANES),
                                   lambda core, j: (core, 0, 0)),
            scratch_shapes=[pltpu.VMEM((_SUBLANES, tile_c), jnp.float32)],
        ),
        compiler_params=pltpu.CompilerParams(
            dimension_semantics=("parallel", "arbitrary"),
            vmem_limit_bytes=vmem_limit,
        ),
    )(preds_r, target_r)

    # Per-core partials live at [core, 0, 0]; the rest of each block is zero.
    return jnp.sum(partials)


def quantile_loss_ref(preds, target, quantiles):
    """Pure-JAX reference mirroring the PyTorch forward."""
    losses = []
    for i, q in enumerate(quantiles):
        errors = target - preds[:, i]
        losses.append(jnp.maximum((q - 1.0) * errors, q * errors)[:, None])
    return jnp.mean(jnp.sum(jnp.concatenate(losses, axis=1), axis=1))


if __name__ == "__main__":
    quantiles = [0.1, 0.5, 0.9]
    Q = len(quantiles)

    # Small deterministic batch.
    N = 16
    kp, kt = jax.random.split(jax.random.PRNGKey(0))
    preds = jax.random.normal(kp, (N, Q), dtype=jnp.float32)
    target = jax.random.normal(kt, (N,), dtype=jnp.float32)

    loss_fn = jax.jit(lambda p, t: quantile_loss(p, t, quantiles))
    loss = jax.block_until_ready(loss_fn(preds, target))
    ref = quantile_loss_ref(preds, target, quantiles)
    assert jnp.allclose(loss, ref, rtol=1e-5, atol=1e-6), (loss, ref)

    # Larger ragged batch with a small forced tile: exercises multi-tile
    # accumulation, the partial (masked) last tile, and the odd tile count
    # across the 2-wide "parallel" core axis (one fully-masked overhang tile).
    N2 = 5000
    kp2, kt2 = jax.random.split(jax.random.PRNGKey(1))
    preds2 = jax.random.normal(kp2, (N2, Q), dtype=jnp.float32)
    target2 = jax.random.normal(kt2, (N2,), dtype=jnp.float32)
    loss_fn2 = jax.jit(lambda p, t: quantile_loss(p, t, quantiles, max_tile_c=256))
    loss2 = jax.block_until_ready(loss_fn2(preds2, target2))
    ref2 = quantile_loss_ref(preds2, target2, quantiles)
    assert jnp.allclose(loss2, ref2, rtol=1e-4, atol=1e-6), (loss2, ref2)

    print("KERNEL_OK")
</pallas_src>

<mosaic_0001>
module attributes {stable_mosaic.version = 11 : i64} {
  func.func @kernel(%arg0: i32, %arg1: i32, %arg2: memref<3x8x128xf32, #tpu.memory_space<vmem>>, %arg3: memref<8x128xf32, #tpu.memory_space<vmem>>, %arg4: memref<1x8x128xf32, #tpu.memory_space<vmem>>, %arg5: memref<8x128xf32, #tpu.memory_space<vmem>>) attributes {dimension_semantics = [#tpu.dimension_semantics<parallel>, #tpu.dimension_semantics<arbitrary>], iteration_bounds = array<i64: 2, 1>, scalar_prefetch = 0 : i64, scratch_operands = 1 : i64, tpu.core_type = #tpu.core_type<tc>, window_params = [{transform_indices = @transform_0, window_bounds = array<i64: 3, 8, 128>}, {transform_indices = @transform_1, window_bounds = array<i64: 8, 128>}, {transform_indices = @transform_2, window_bounds = array<i64: 1, 8, 128>}]} {
    %c0_i32 = arith.constant 0 : i32
    %0 = arith.cmpi eq, %arg1, %c0_i32 : i32
    %1 = arith.extui %0 : i1 to i32
    %c0_i32_0 = arith.constant 0 : i32
    %2 = arith.cmpi ne, %1, %c0_i32_0 : i32
    scf.if %2 {
      %cst = arith.constant 0.000000e+00 : f32
      %16 = vector.broadcast %cst : f32 to vector<8x128xf32>
      %c0 = arith.constant 0 : index
      %c0_7 = arith.constant 0 : index
      %17 = vector.load %arg5[%c0, %c0_7] : memref<8x128xf32, #tpu.memory_space<vmem>>, vector<8x128xf32>
      tpu.vector_store %arg5[%c0, %c0_7], %16 {strides = array<i32>} : memref<8x128xf32, #tpu.memory_space<vmem>>, vector<8x128xf32>,
    } else {
    }
    %c1_i32 = arith.constant 1 : i32
    %3 = arith.muli %arg0, %c1_i32 : i32
    %4 = arith.addi %3, %arg1 : i32
    %c1_i32_1 = arith.constant 1 : i32
    %5 = arith.addi %4, %c1_i32_1 : i32
    %c128_i32 = arith.constant 128 : i32
    %6 = arith.muli %5, %c128_i32 : i32
    %c128_i32_2 = arith.constant 128 : i32
    %7 = arith.cmpi sle, %6, %c128_i32_2 : i32
    %8 = arith.extui %7 : i1 to i32
    %c0_i32_3 = arith.constant 0 : i32
    %9 = arith.cmpi ne, %8, %c0_i32_3 : i32
    scf.if %9 {
      %c0 = arith.constant 0 : index
      %c0_7 = arith.constant 0 : index
      %16 = vector.load %arg5[%c0, %c0_7] : memref<8x128xf32, #tpu.memory_space<vmem>>, vector<8x128xf32>
      %c0_8 = arith.constant 0 : index
      %c0_9 = arith.constant 0 : index
      %17 = vector.load %arg3[%c0_8, %c0_9] : memref<8x128xf32, #tpu.memory_space<vmem>>, vector<8x128xf32>
      %c0_10 = arith.constant 0 : index
      %c0_11 = arith.constant 0 : index
      %c0_12 = arith.constant 0 : index
      %18 = vector.load %arg2[%c0_10, %c0_11, %c0_12] : memref<3x8x128xf32, #tpu.memory_space<vmem>>, vector<1x8x128xf32>
      %19 = vector.shape_cast %18 : vector<1x8x128xf32> to vector<8x128xf32>
      %20 = arith.subf %17, %19 : vector<8x128xf32>
      %cst = arith.constant -0.899999976 : f32
      %21 = vector.broadcast %cst : f32 to vector<8x128xf32>
      %22 = arith.mulf %21, %20 : vector<8x128xf32>
      %cst_13 = arith.constant 1.000000e-01 : f32
      %23 = vector.broadcast %cst_13 : f32 to vector<8x128xf32>
      %24 = arith.mulf %23, %20 : vector<8x128xf32>
      %25 = arith.maximumf %22, %24 : vector<8x128xf32>
      %c1 = arith.constant 1 : index
      %c0_14 = arith.constant 0 : index
      %c0_15 = arith.constant 0 : index
      %26 = vector.load %arg2[%c1, %c0_14, %c0_15] : memref<3x8x128xf32, #tpu.memory_space<vmem>>, vector<1x8x128xf32>
      %27 = vector.shape_cast %26 : vector<1x8x128xf32> to vector<8x128xf32>
      %28 = arith.subf %17, %27 : vector<8x128xf32>
      %cst_16 = arith.constant -5.000000e-01 : f32
      %29 = vector.broadcast %cst_16 : f32 to vector<8x128xf32>
      %30 = arith.mulf %29, %28 : vector<8x128xf32>
      %cst_17 = arith.constant 5.000000e-01 : f32
      %31 = vector.broadcast %cst_17 : f32 to vector<8x128xf32>
      %32 = arith.mulf %31, %28 : vector<8x128xf32>
      %33 = arith.maximumf %30, %32 : vector<8x128xf32>
      %34 = arith.addf %25, %33 : vector<8x128xf32>
      %c2 = arith.constant 2 : index
      %c0_18 = arith.constant 0 : index
      %c0_19 = arith.constant 0 : index
      %35 = vector.load %arg2[%c2, %c0_18, %c0_19] : memref<3x8x128xf32, #tpu.memory_space<vmem>>, vector<1x8x128xf32>
      %36 = vector.shape_cast %35 : vector<1x8x128xf32> to vector<8x128xf32>
      %37 = arith.subf %17, %36 : vector<8x128xf32>
      %cst_20 = arith.constant -1.000000e-01 : f32
      %38 = vector.broadcast %cst_20 : f32 to vector<8x128xf32>
      %39 = arith.mulf %38, %37 : vector<8x128xf32>
      %cst_21 = arith.constant 0.899999976 : f32
      %40 = vector.broadcast %cst_21 : f32 to vector<8x128xf32>
      %41 = arith.mulf %40, %37 : vector<8x128xf32>
      %42 = arith.maximumf %39, %41 : vector<8x128xf32>
      %43 = arith.addf %34, %42 : vector<8x128xf32>
      %44 = arith.addf %16, %43 : vector<8x128xf32>
      %c0_22 = arith.constant 0 : index
      %c0_23 = arith.constant 0 : index
      %45 = vector.load %arg5[%c0_22, %c0_23] : memref<8x128xf32, #tpu.memory_space<vmem>>, vector<8x128xf32>
      tpu.vector_store %arg5[%c0_22, %c0_23], %44 {strides = array<i32>} : memref<8x128xf32, #tpu.memory_space<vmem>>, vector<8x128xf32>,
    } else {
    }
    %true = arith.constant true
    %10 = arith.xori %7, %true : i1
    %11 = arith.extui %10 : i1 to i32
    %c0_i32_4 = arith.constant 0 : i32
    %12 = arith.cmpi ne, %11, %c0_i32_4 : i32
    scf.if %12 {
      %16 = tpu.iota {dimensions = array<i32: 1>} : vector<8x128xi32>
      %c128_i32_7 = arith.constant 128 : i32
      %17 = arith.muli %4, %c128_i32_7 : i32
      %18 = vector.broadcast %17 : i32 to vector<8x128xi32>
      %19 = arith.addi %16, %18 : vector<8x128xi32>
      %c0 = arith.constant 0 : index
      %c0_8 = arith.constant 0 : index
      %20 = vector.load %arg5[%c0, %c0_8] : memref<8x128xf32, #tpu.memory_space<vmem>>, vector<8x128xf32>
      %c128_i32_9 = arith.constant 128 : i32
      %21 = vector.broadcast %c128_i32_9 : i32 to vector<8x128xi32>
      %22 = arith.cmpi slt, %19, %21 : vector<8x128xi32>
      %c0_10 = arith.constant 0 : index
      %c0_11 = arith.constant 0 : index
      %23 = vector.load %arg3[%c0_10, %c0_11] : memref<8x128xf32, #tpu.memory_space<vmem>>, vector<8x128xf32>
      %c0_12 = arith.constant 0 : index
      %c0_13 = arith.constant 0 : index
      %c0_14 = arith.constant 0 : index
      %24 = vector.load %arg2[%c0_12, %c0_13, %c0_14] : memref<3x8x128xf32, #tpu.memory_space<vmem>>, vector<1x8x128xf32>
      %25 = vector.shape_cast %24 : vector<1x8x128xf32> to vector<8x128xf32>
      %26 = arith.subf %23, %25 : vector<8x128xf32>
      %cst = arith.constant -0.899999976 : f32
      %27 = vector.broadcast %cst : f32 to vector<8x128xf32>
      %28 = arith.mulf %27, %26 : vector<8x128xf32>
      %cst_15 = arith.constant 1.000000e-01 : f32
      %29 = vector.broadcast %cst_15 : f32 to vector<8x128xf32>
      %30 = arith.mulf %29, %26 : vector<8x128xf32>
      %31 = arith.maximumf %28, %30 : vector<8x128xf32>
      %c1 = arith.constant 1 : index
      %c0_16 = arith.constant 0 : index
      %c0_17 = arith.constant 0 : index
      %32 = vector.load %arg2[%c1, %c0_16, %c0_17] : memref<3x8x128xf32, #tpu.memory_space<vmem>>, vector<1x8x128xf32>
      %33 = vector.shape_cast %32 : vector<1x8x128xf32> to vector<8x128xf32>
      %34 = arith.subf %23, %33 : vector<8x128xf32>
      %cst_18 = arith.constant -5.000000e-01 : f32
      %35 = vector.broadcast %cst_18 : f32 to vector<8x128xf32>
      %36 = arith.mulf %35, %34 : vector<8x128xf32>
      %cst_19 = arith.constant 5.000000e-01 : f32
      %37 = vector.broadcast %cst_19 : f32 to vector<8x128xf32>
      %38 = arith.mulf %37, %34 : vector<8x128xf32>
      %39 = arith.maximumf %36, %38 : vector<8x128xf32>
      %40 = arith.addf %31, %39 : vector<8x128xf32>
      %c2 = arith.constant 2 : index
      %c0_20 = arith.constant 0 : index
      %c0_21 = arith.constant 0 : index
      %41 = vector.load %arg2[%c2, %c0_20, %c0_21] : memref<3x8x128xf32, #tpu.memory_space<vmem>>, vector<1x8x128xf32>
      %42 = vector.shape_cast %41 : vector<1x8x128xf32> to vector<8x128xf32>
      %43 = arith.subf %23, %42 : vector<8x128xf32>
      %cst_22 = arith.constant -1.000000e-01 : f32
      %44 = vector.broadcast %cst_22 : f32 to vector<8x128xf32>
      %45 = arith.mulf %44, %43 : vector<8x128xf32>
      %cst_23 = arith.constant 0.899999976 : f32
      %46 = vector.broadcast %cst_23 : f32 to vector<8x128xf32>
      %47 = arith.mulf %46, %43 : vector<8x128xf32>
      %48 = arith.maximumf %45, %47 : vector<8x128xf32>
      %49 = arith.addf %40, %48 : vector<8x128xf32>
      %cst_24 = arith.constant 0.000000e+00 : f32
      %50 = vector.broadcast %cst_24 : f32 to vector<8x128xf32>
      %51 = arith.select %22, %49, %50 : vector<8x128xi1>, vector<8x128xf32>
      %52 = arith.addf %20, %51 : vector<8x128xf32>
      %c0_25 = arith.constant 0 : index
      %c0_26 = arith.constant 0 : index
      %53 = vector.load %arg5[%c0_25, %c0_26] : memref<8x128xf32, #tpu.memory_space<vmem>>, vector<8x128xf32>
      tpu.vector_store %arg5[%c0_25, %c0_26], %52 {strides = array<i32>} : memref<8x128xf32, #tpu.memory_space<vmem>>, vector<8x128xf32>,
    } else {
    }
    %c0_i32_5 = arith.constant 0 : i32
    %13 = arith.cmpi eq, %arg1, %c0_i32_5 : i32
    %14 = arith.extui %13 : i1 to i32
    %c0_i32_6 = arith.constant 0 : i32
    %15 = arith.cmpi ne, %14, %c0_i32_6 : i32
    scf.if %15 {
      %c0 = arith.constant 0 : index
      %c0_7 = arith.constant 0 : index
      %16 = vector.load %arg5[%c0, %c0_7] : memref<8x128xf32, #tpu.memory_space<vmem>>, vector<8x128xf32>
      %17 = vector.shape_cast %16 : vector<8x128xf32> to vector<1x8x128xf32>
      %cst = arith.constant dense<0.000000e+00> : vector<1xf32>
      %18 = vector.multi_reduction <add>, %17, %cst [1, 2] : vector<1x8x128xf32> to vector<1xf32>
      %19 = vector.shape_cast %18 : vector<1xf32> to vector<1x1x1xf32>
      %20 = vector.extract %19[0, 0, 0] : f32 from vector<1x1x1xf32>
      %cst_8 = arith.constant 6.250000e-02 : f32
      %21 = arith.mulf %20, %cst_8 : f32
      %22 = tpu.iota {dimensions = array<i32: 1>} : vector<1x8x128xi32>
      %23 = tpu.iota {dimensions = array<i32: 2>} : vector<1x8x128xi32>
      %c0_i32_9 = arith.constant 0 : i32
      %24 = vector.broadcast %c0_i32_9 : i32 to vector<1x8x128xi32>
      %25 = arith.cmpi eq, %22, %24 : vector<1x8x128xi32>
      %c0_i32_10 = arith.constant 0 : i32
      %26 = vector.broadcast %c0_i32_10 : i32 to vector<1x8x128xi32>
      %27 = arith.cmpi eq, %23, %26 : vector<1x8x128xi32>
      %28 = arith.andi %25, %27 : vector<1x8x128xi1>
      %cst_11 = arith.constant 0.000000e+00 : f32
      %29 = vector.broadcast %21 : f32 to vector<1x8x128xf32>
      %30 = vector.broadcast %cst_11 : f32 to vector<1x8x128xf32>
      %31 = arith.select %28, %29, %30 : vector<1x8x128xi1>, vector<1x8x128xf32>
      %c0_12 = arith.constant 0 : index
      %c0_13 = arith.constant 0 : index
      %c0_14 = arith.constant 0 : index
      %32 = vector.load %arg4[%c0_12, %c0_13, %c0_14] : memref<1x8x128xf32, #tpu.memory_space<vmem>>, vector<1x8x128xf32>
      tpu.vector_store %arg4[%c0_12, %c0_13, %c0_14], %31 {strides = array<i32>} : memref<1x8x128xf32, #tpu.memory_space<vmem>>, vector<1x8x128xf32>,
    } else {
    }
    return
  }
  func.func @transform_0(%arg0: i32, %arg1: i32) -> (i32, i32, i32) {
    %c1_i32 = arith.constant 1 : i32
    %0 = arith.muli %arg0, %c1_i32 : i32
    %1 = arith.addi %0, %arg1 : i32
    %c0_i32 = arith.constant 0 : i32
    %2 = arith.minsi %1, %c0_i32 : i32
    %c0_i32_0 = arith.constant 0 : i32
    %c0_i32_1 = arith.constant 0 : i32
    %c0_i32_2 = arith.constant 0 : i32
    return %c0_i32_0, %c0_i32_1, %2 : i32, i32, i32
  }
  func.func @transform_1(%arg0: i32, %arg1: i32) -> (i32, i32) {
    %c1_i32 = arith.constant 1 : i32
    %0 = arith.muli %arg0, %c1_i32 : i32
    %1 = arith.addi %0, %arg1 : i32
    %c0_i32 = arith.constant 0 : i32
    %2 = arith.minsi %1, %c0_i32 : i32
    %c0_i32_0 = arith.constant 0 : i32
    %c0_i32_1 = arith.constant 0 : i32
    return %c0_i32_0, %2 : i32, i32
  }
  func.func @transform_2(%arg0: i32, %arg1: i32) -> (i32, i32, i32) {
    %c0_i32 = arith.constant 0 : i32
    %c0_i32_0 = arith.constant 0 : i32
    %c0_i32_1 = arith.constant 0 : i32
    return %arg0, %c0_i32, %c0_i32_0 : i32, i32, i32
  }
}

</mosaic_0001>

<bundles_post_ra>
// kernel: _lambda_.1
= control target key start
LH: loop header
LB: loop body
LE: loop exit
PB: predicated region body
PF: predicated region fallthrough
CT: control target
= control target key end

     0   :  { %s469_s9 = smov 0   ;;  %s471_s10 = smov 0   ;;  %s531_s0 = inlined_call_operand.vmem [shape: f32[3,8,128], index: 0, kind: input, shape index: {}]   ;;  %s532_s1 = inlined_call_operand.vmem [shape: f32[8,128], index: 1, kind: input, shape index: {}]   ;;  %s533_s2 = inlined_call_operand.vmem [shape: f32[2,8,128], index: 2, kind: output, shape index: {}]  }
   0x1   :  { %s473_s11 = smov 0  }
   0x2 LB: > { %s24_s12 = sadd.s32 1, %s447_s10  ;;  %p380_p0 = scmp.ge.s32.totalorder %s451_s11, 1  ;;  %s451_s11 = sphi %s473_s11, %s12_s11   ;;  %s447_s10 = sphi %s471_s10, %s535_s10   ;;  %s443_s9 = sphi %s469_s9, %s534_s9  }
   0x3   : > { %p26_p1 = scmp.ge.s32.totalorder %s24_s12, 2  ;;  %p156_p2 = scmp.lt.s32.totalorder %s451_s11, 3 }
   0x5   : > { %s537_s12 = smov (%p26_p1, %s24_s12), 0  ;;  %p157_p3 = pnand %p380_p0, %p156_p2 }
   0x6   : > { %p187_p4 = scmp.lt.s32.totalorder (!%p157_p3), %s443_s9, 0  ;;  %p206_p5 = scmp.lt.s32.totalorder (!%p157_p3), %s443_s9, 1  ;;  %v453_v0 = vmov (!%p157_p3), 0.0  }
   0x7   : > { %160 = sbr.rel (%p157_p3) target bundleno = 267 (0x10b), region = 28  ;;  %214 = vst [vmem:[#allocation2] sm:$0xff] (!%p157_p3), %v453_v0  ;;  %s400_s13 = sshll.u32 (!%p157_p3), %s443_s9, 7 }
   0x8   : > { %s496_s17 = sadd.s32 (!%p157_p3), 128, %s400_s13 }
   0x9   : > { %p391_p6 = scmp.gt.s32.totalorder (!%p157_p3), %s496_s17, 128 }
   0xe   : > { %s188_s14 = scalar_select %p187_p4, %s443_s9, 0 }
   0xf   : > { %s207_s15 = scalar_select %p206_p5, %s443_s9, 1 }
  0x10   : > { %s539_s14 = smov (!%p187_p4, %s188_s14), 0  ;;  %221 = sbr.rel (%p391_p6) target bundleno = 34 (0x22), region = 36 }
  0x11   : > { %s389_s16 = sshll.u32 %s207_s15, 3  ;;  %s384_s18 = sshll.u32 %s539_s14, 3  ;;  %v222_v18 = vld [vmem:[#allocation2] sm:$0xff] (!%p391_p6) }
  0x12   : > { %s501_s21 = scalar_lea.vmem %s533_s2, %s389_s16  ;;  %s506_s24 = scalar_lea.vmem %s531_s0, %s384_s18 }
  0x13   : > { %s202_s27 = scalar_lea.vmem %s532_s1, %s384_s18  ;;  %v224_v2 = vld [vmem:[%s506_s24] sm:$0xff] (!%p391_p6)  ;;  %v392_v4 = vld [vmem:[%s506_s24 + $0x8] sm:$0xff] (!%p391_p6)  ;;  %v393_v5 = vld [vmem:[%s506_s24 + $0x10] sm:$0xff] (!%p391_p6) }
  0x14   : > { %v223_v1 = vld [vmem:[%s202_s27] sm:$0xff] (!%p391_p6) }
  0x15   : > { %v225_v3 = vsub.f32 (!%p391_p6), %v223_v1, %v224_v2  ;;  %v231_v6 = vsub.f32 (!%p391_p6), %v223_v1, %v392_v4  ;;  %v238_v7 = vsub.f32 (!%p391_p6), %v223_v1, %v393_v5 }
  0x17   : > { %v226_v8 = vmul.f32 -0.9, %v225_v3  ;;  %v227_v9 = vmul.f32 0.1, %v225_v3  ;;  %v232_v10 = vmul.f32 -0.5, %v231_v6  ;;  %v233_v11 = vmul.f32 0.5, %v231_v6 }
  0x18   : > { %v239_v12 = vmul.f32 -0.1, %v238_v7  ;;  %v240_v13 = vmul.f32 0.9, %v238_v7 }
  0x19   : > { %v228_v14 = vmax.f32 %v226_v8, %v227_v9  ;;  %v234_v15 = vmax.f32 %v232_v10, %v233_v11 }
  0x1a   : > { %v241_v16 = vmax.f32 %v239_v12, %v240_v13 }
  0x1b   : > { %v235_v17 = vadd.f32 %v234_v15, %v228_v14 }
  0x1d   : > { %v242_v19 = vadd.f32 %v241_v16, %v235_v17 }
  0x1f   : > { %v243_v20 = vadd.f32 %v242_v19, %v222_v18 }
  0x21   : > { %244 = vst [vmem:[#allocation2] sm:$0xff] %v243_v20 }
  0x22 PF: > { %p394_p7 = scmp.le.s32.totalorder %s496_s17, 128 }
  0x23   : > { %v249_v21 = vlaneseq (!%p394_p7)  ;;  %v256_v22 = vld [vmem:[%s202_s27] sm:$0xff] (!%p394_p7)  ;;  %v396_v25 = vld [vmem:[%s506_s24 + $0x8] sm:$0xff] (!%p394_p7)  ;;  %v397_v26 = vld [vmem:[%s506_s24 + $0x10] sm:$0xff] (!%p394_p7)  ;;  %v252_v28 = vstv (!%p394_p7), %s400_s13 }
  0x24   : > { %248 = sbr.rel (%p394_p7) target bundleno = 51 (0x33), region = 40  ;;  %v257_v23 = vld [vmem:[%s506_s24] sm:$0xff] (!%p394_p7)  ;;  %v264_v29 = vsub.f32 (!%p394_p7), %v256_v22, %v396_v25  ;;  %v271_v30 = vsub.f32 (!%p394_p7), %v256_v22, %v397_v26 }
  0x25   : > { %v258_v24 = vsub.f32 (!%p394_p7), %v256_v22, %v257_v23  ;;  %v250_v27 = vand.u32 (!%p394_p7), 127, %v249_v21 }
  0x26   : > { %v265_v33 = vmul.f32 (!%p394_p7), -0.5, %v264_v29  ;;  %v266_v34 = vmul.f32 (!%p394_p7), 0.5, %v264_v29  ;;  %v272_v35 = vmul.f32 (!%p394_p7), -0.1, %v271_v30  ;;  %v273_v38 = vmul.f32 (!%p394_p7), 0.9, %v271_v30 }
  0x27   : > { %v259_v31 = vmul.f32 (!%p394_p7), -0.9, %v258_v24  ;;  %v260_v32 = vmul.f32 (!%p394_p7), 0.1, %v258_v24  ;;  %v253_v36 = vadd.s32 (!%p394_p7), %v252_v28, %v250_v27 }
  0x28   : > { %v267_v39 = vmax.f32 (!%p394_p7), %v265_v33, %v266_v34  ;;  %v274_v40 = vmax.f32 (!%p394_p7), %v272_v35, %v273_v38  ;;  %v254_v42 = vld [vmem:[#allocation2] sm:$0xff] (!%p394_p7) }
  0x29   : > { %v261_v37 = vmax.f32 (!%p394_p7), %v259_v31, %v260_v32  ;;  %vm255_vm0 = vcmp.lt.s32.totalorder (!%p394_p7), %v253_v36, 128 }
  0x2b   : > { %v268_v41 = vadd.f32 %v267_v39, %v261_v37 }
  0x2d   : > { %v275_v43 = vadd.f32 %v274_v40, %v268_v41 }
  0x2f   : > { %v276_v44 = vsel %vm255_vm0, %v275_v43, 0.0 }
  0x30   : > { %v277_v45 = vadd.f32 %v276_v44, %v254_v42 }
  0x32   : > { %278 = vst [vmem:[#allocation2] sm:$0xff] %v277_v45 }
  0x33 PF: > { %v293_v54 = vlaneseq }
  0x35   : > { %v294_v55 = vshrl.u32 %v293_v54, 7  ;;  %v296_v56 = vand.u32 127, %v293_v54 }
  0x37   : > { %vm297_vm1 = vcmp.eq.s32.totalorder %v294_v55, 0  ;;  %vm298_vm2 = vcmp.eq.s32.totalorder %v296_v56, 0 }
  0x38   : > { %vm299_vm3 = vmand %vm297_vm1, %vm298_vm2 }
  0x39   : > { %v282_v46 = vld [vmem:[#allocation2] sm:$0xff] }
  0x3a   : > { %283 = vadd.xlane.f32.xlu0 %v282_v46 }
  0xc7   : > { %v284_v47 = vpop.xlane.xlu0 %283 }
  0xc8   : > { %v285_v48 = vrot.slane %v284_v47, 4 }
  0xca   : > { %v286_v49 = vadd.f32 %v285_v48, %v284_v47 }
  0xcc   : > { %v287_v50 = vrot.slane %v286_v49, 2 }
  0xce   : > { %v288_v51 = vadd.f32 %v287_v50, %v286_v49 }
  0xd0   : > { %v289_v52 = vrot.slane %v288_v51, 1 }
  0xd2   : > { %v290_v53 = vadd.f32 %v289_v52, %v288_v51 }
  0xd4   : > { %402 = vpush %v290_v53 }
 0x105   : > { %s403_s28 = spop %402 }
 0x106   : > { %s292_s29 = smul.f32 0.0625, %s403_s28 }
 0x108   : > { %v300_v57 = vstv %s292_s29 }
 0x109   : > { %v301_v58 = vsel %vm299_vm3, %v300_v57, 0.0 }
 0x10a   : > { %302 = vst [vmem:[%s501_s21] sm:$0xff] %v301_v58 }
 0x10b PF: > { %s12_s11 = sadd.s32 1, %s451_s11   ;;  %s534_s9 = smov %s447_s10 }
 0x10c   : > { %p9_p8 = scmp.ge.s32.totalorder %s12_s11, 4   ;;  %s535_s10 = smov %s537_s12 }
 0x10e   :  { %11 = sbr.rel (!%p9_p8) target bundleno = 2 (0x2), region = 81 }

</bundles_post_ra>
